<compile_context>
chip_gen: v6e
topology: v6e:2x2x1
jax: 0.10.0
libtpu: 0.0.40
codegen_flags: <defaults>
</compile_context>

<pallas_src>
import functools
import math

import jax
import jax.numpy as jnp
from jax import lax
from jax.experimental import pallas as pl
from jax.experimental.pallas import tpu as pltpu


def _range_bn_kernel(x_ref, gamma_ref, beta_ref, o_ref, mean_ref, scale_ref,
                     *, num_chunks: int, eps: float, scale_fix: float):
    B, tc, hw = x_ref.shape
    C = gamma_ref.shape[0]
    n_total = B * hw
    cs = n_total // num_chunks                       # static chunk size
    f32 = jnp.float32

    xdt = jnp.dtype(x_ref.dtype)
    if xdt in (jnp.dtype(jnp.float32), jnp.dtype(jnp.bfloat16), jnp.dtype(jnp.float16)):
        cdt = xdt                                    # keep bf16 elementwise on v6e/v7x
    else:
        cdt = f32

    x = x_ref[...]                                   # (B, tc, HW), native dtype, single load

    def _acc(a, v):
        return v if a is None else a + v

    sum_max = None
    sum_min = None
    total_sum = None

    if hw % cs == 0 and cs % 128 == 0:
        # Fast path: every chunk is a lane-aligned slice of a single image.
        cpi = hw // cs                               # chunks per image
        for c in range(num_chunks):
            b = c // cpi
            off = (c % cpi) * cs                     # static, multiple of 128
            sl = x[b, :, off:off + cs]               # (tc, cs)
            mx = jnp.max(sl, axis=-1, keepdims=True)
            mn = jnp.min(sl, axis=-1, keepdims=True)
            sm = jnp.sum(sl, axis=-1, keepdims=True, dtype=f32)
            sum_max = _acc(sum_max, mx.astype(f32))
            sum_min = _acc(sum_min, mn.astype(f32))
            total_sum = _acc(total_sum, sm)
    else:
        # General path: per-(image, chunk) masked reductions with static overlap skipping.
        # Only 2-D ops (lane-axis reductions, lane iota); no unaligned lane slices.
        il = lax.broadcasted_iota(jnp.int32, (tc, hw), 1)      # lane index within an image
        ch_max = [None] * num_chunks
        ch_min = [None] * num_chunks
        for b in range(B):
            xb = x[b]                                # (tc, HW)
            base = b * hw
            # mean contribution (folded into the batch loop: one pass over the data)
            total_sum = _acc(total_sum, jnp.sum(xb, axis=-1, keepdims=True, dtype=f32))
            for c in range(num_chunks):
                lo = c * cs - base
                hi = (c + 1) * cs - base
                if hi <= 0 or lo >= hw:
                    continue                         # chunk does not touch this image
                if lo <= 0 and hi >= hw:             # chunk covers the whole image
                    mx = jnp.max(xb, axis=-1, keepdims=True)
                    mn = jnp.min(xb, axis=-1, keepdims=True)
                else:                                # partial coverage -> masked reduce
                    m = (il >= lo) & (il < hi)
                    mx = jnp.max(jnp.where(m, xb, -jnp.inf), axis=-1, keepdims=True)
                    mn = jnp.min(jnp.where(m, xb, jnp.inf), axis=-1, keepdims=True)
                ch_max[c] = mx if ch_max[c] is None else jnp.maximum(ch_max[c], mx)
                ch_min[c] = mn if ch_min[c] is None else jnp.minimum(ch_min[c], mn)
        for c in range(num_chunks):
            sum_max = _acc(sum_max, ch_max[c].astype(f32))
            sum_min = _acc(sum_min, ch_min[c].astype(f32))

    inv_nc = 1.0 / float(num_chunks)
    mean_max = sum_max * inv_nc                      # (tc, 1) f32
    mean_min = sum_min * inv_nc
    mean = total_sum * (1.0 / float(n_total))
    scale = 1.0 / ((mean_max - mean_min) * scale_fix + eps)

    mean_ref[...] = mean
    scale_ref[...] = scale

    # Per-channel affine params: resident (C,1) block, slice this tile's rows.
    if tc == C:
        g = gamma_ref[...]
        bt = beta_ref[...]
    else:
        start = pl.multiple_of(pl.program_id(0) * tc, tc)
        g = gamma_ref[pl.ds(start, tc), :]
        bt = beta_ref[pl.ds(start, tc), :]

    mul = (scale * g).astype(cdt)[None]              # (1, tc, 1)
    sub = mean.astype(cdt)[None]
    add = bt.astype(cdt)[None]
    o_ref[...] = ((x.astype(cdt) - sub) * mul + add).astype(o_ref.dtype)


def _sublane_multiple(dtype) -> int:
    # Sub-32-bit dtypes pack along sublanes: native tiles are (8,128)/(16,128)/(32,128).
    return {4: 8, 2: 16, 1: 32}.get(jnp.dtype(dtype).itemsize, 8)


def _physical_vmem_bytes() -> int:
    try:
        return int(pltpu.get_tpu_info().vmem_capacity_bytes)
    except Exception:
        return 64 << 20                              # assume the smallest (v7x per-TC VMEM)


def _pick_channel_tile(B: int, C: int, HW: int, dtype):
    """Largest legal channel tile whose per-step working set (2x in + 2x out double
    buffers + ~2 tile-sized f32 temporaries) fits a per-generation VMEM budget, while
    keeping >=2 grid steps when C allows (v7x dual-TensorCore sharding)."""
    item = jnp.dtype(dtype).itemsize
    sub = _sublane_multiple(dtype)
    cap = _physical_vmem_bytes()
    budget = min(int(cap * 0.6), 48 << 20)           # target resident bytes per grid step
    per_c = B * HW * (4 * item + 2 * 4)              # per-channel-row working-set bytes

    cands = [d for d in range(sub, C + 1, sub) if C % d == 0]
    if not cands:
        cands = [C]                                  # full-dim block is always legal
    fitting = [d for d in cands if d * per_c <= budget] or [min(cands)]
    multi = [d for d in fitting if C // d >= 2]      # keep >=2 steps for megacore when possible
    tc = max(multi) if multi else max(fitting)

    needed = tc * per_c + (2 << 20)                  # + gamma/beta/mean/scale + slack
    vmem_limit = min(int(cap * 0.85), max(needed, 32 << 20))
    return tc, int(vmem_limit)


def range_bn(x, gamma, beta, running_mean, running_var,
             *, num_chunks: int = 8, eps: float = 1e-5, momentum: float = 0.1):
    B, C, H, W = x.shape
    HW = H * W
    N = B * HW
    assert N % num_chunks == 0, f"B*H*W={N} not divisible by num_chunks={num_chunks}"
    cs = N // num_chunks
    scale_fix = 1.0 / math.sqrt(2.0 * math.log(cs))

    # Native layout: only merge (H, W) -> HW (a free reshape, no HBM transpose).
    x3 = x.reshape(B, C, HW)
    gamma2 = gamma.reshape(C, 1).astype(jnp.float32)
    beta2 = beta.reshape(C, 1).astype(jnp.float32)

    tc, vmem_limit = _pick_channel_tile(B, C, HW, x.dtype)
    grid = (C // tc,)

    kernel = functools.partial(_range_bn_kernel,
                               num_chunks=num_chunks, eps=eps, scale_fix=scale_fix)

    itemsize = jnp.dtype(x.dtype).itemsize
    cost = pl.CostEstimate(flops=8 * B * C * HW, transcendentals=0,
                           bytes_accessed=int(2 * B * C * HW * itemsize + 4 * C * 4))

    out3, mean, scale = pl.pallas_call(
        kernel,
        out_shape=(jax.ShapeDtypeStruct((B, C, HW), x.dtype),
                   jax.ShapeDtypeStruct((C, 1), jnp.float32),
                   jax.ShapeDtypeStruct((C, 1), jnp.float32)),
        grid=grid,
        in_specs=[
            pl.BlockSpec((B, tc, HW), lambda i: (0, i, 0)),
            pl.BlockSpec((C, 1), lambda i: (0, 0)),   # resident across all grid steps
            pl.BlockSpec((C, 1), lambda i: (0, 0)),   # resident across all grid steps
        ],
        out_specs=(
            pl.BlockSpec((B, tc, HW), lambda i: (0, i, 0)),
            pl.BlockSpec((tc, 1), lambda i: (i, 0)),
            pl.BlockSpec((tc, 1), lambda i: (i, 0)),
        ),
        compiler_params=pltpu.CompilerParams(
            dimension_semantics=("parallel",),
            vmem_limit_bytes=vmem_limit,
        ),
        cost_estimate=cost,
    )(x3, gamma2, beta2)

    out = out3.reshape(B, C, H, W)
    mean = mean.reshape(C)
    scale = scale.reshape(C)

    # Running-buffer update, exactly as the PyTorch in-place ops do it.
    new_running_mean = running_mean * momentum + mean * (1.0 - momentum)
    new_running_var = running_var * momentum + scale * (1.0 - momentum)
    return out, new_running_mean, new_running_var


def range_bn_reference(x, gamma, beta, running_mean, running_var,
                       *, num_chunks=8, eps=1e-5, momentum=0.1):
    """Pure-JAX mirror of the PyTorch forward."""
    B, C, H, W = x.shape
    N = B * H * W
    cs = N // num_chunks
    y = jnp.transpose(x, (1, 0, 2, 3)).reshape(C, num_chunks, cs).astype(jnp.float32)
    mean_max = jnp.mean(jnp.max(y, axis=-1), axis=-1)
    mean_min = jnp.mean(jnp.min(y, axis=-1), axis=-1)
    mean = jnp.mean(y.reshape(C, -1), axis=-1)
    scale_fix = 1.0 / (2.0 * math.log(cs)) ** 0.5
    scale = 1.0 / ((mean_max - mean_min) * scale_fix + eps)
    new_rm = running_mean * momentum + mean * (1.0 - momentum)
    new_rv = running_var * momentum + scale * (1.0 - momentum)
    out = (x - mean.reshape(1, C, 1, 1)) * scale.reshape(1, C, 1, 1)
    out = out * gamma.reshape(1, C, 1, 1) + beta.reshape(1, C, 1, 1)
    return out.astype(x.dtype), new_rm, new_rv


if __name__ == "__main__":
    def _run_case(key, B, C, H, W, num_chunks=8, eps=1e-5, momentum=0.1):
        kx, kg, kb = jax.random.split(key, 3)
        x = jax.random.normal(kx, (B, C, H, W), jnp.float32)
        gamma = jax.random.uniform(kg, (C,), jnp.float32)       # weight.uniform_()
        beta = 0.1 * jax.random.normal(kb, (C,), jnp.float32)   # nonzero to exercise the bias add
        rm = jnp.zeros((C,), jnp.float32)
        rv = jnp.zeros((C,), jnp.float32)

        out, nrm, nrv = range_bn(x, gamma, beta, rm, rv,
                                 num_chunks=num_chunks, eps=eps, momentum=momentum)
        out = jax.block_until_ready(out)

        oref, rmr, rvr = range_bn_reference(x, gamma, beta, rm, rv,
                                            num_chunks=num_chunks, eps=eps, momentum=momentum)
        assert out.shape == (B, C, H, W)
        assert jnp.allclose(out, oref, rtol=1e-5, atol=1e-5), "output mismatch vs reference"
        assert jnp.allclose(nrm, rmr, rtol=1e-5, atol=1e-5), "running_mean mismatch"
        assert jnp.allclose(nrv, rvr, rtol=1e-4, atol=1e-4), "running_var mismatch"

    key = jax.random.PRNGKey(0)
    k1, k2, k3 = jax.random.split(key, 3)
    _run_case(k1, 2, 4, 16, 16)    # canonical shape: masked-chunk path (cs=64, unaligned)
    _run_case(k2, 2, 8, 32, 32)    # lane-aligned chunk-slice fast path (cs=256)
    _run_case(k3, 8, 8, 4, 4)      # whole-image chunk path (cs == H*W)
    print("KERNEL_OK")
</pallas_src>

<mosaic_0001>
module attributes {stable_mosaic.version = 11 : i64} {
  func.func @_range_bn_kernel(%arg0: i32, %arg1: memref<2x4x256xf32, #tpu.memory_space<vmem>>, %arg2: memref<4x1xf32, #tpu.memory_space<vmem>>, %arg3: memref<4x1xf32, #tpu.memory_space<vmem>>, %arg4: memref<2x4x256xf32, #tpu.memory_space<vmem>>, %arg5: memref<4x1xf32, #tpu.memory_space<vmem>>, %arg6: memref<4x1xf32, #tpu.memory_space<vmem>>) attributes {dimension_semantics = [#tpu.dimension_semantics<parallel>], iteration_bounds = array<i64: 1>, scalar_prefetch = 0 : i64, scratch_operands = 0 : i64, tpu.core_type = #tpu.core_type<tc>, window_params = [{transform_indices = @transform_0, window_bounds = array<i64: 2, 4, 256>}, {pipeline_mode = #tpu.pipeline_mode<synchronous>, transform_indices = @transform_1, window_bounds = array<i64: 4, 1>}, {pipeline_mode = #tpu.pipeline_mode<synchronous>, transform_indices = @transform_2, window_bounds = array<i64: 4, 1>}, {transform_indices = @transform_3, window_bounds = array<i64: 2, 4, 256>}, {transform_indices = @transform_4, window_bounds = array<i64: 4, 1>}, {transform_indices = @transform_5, window_bounds = array<i64: 4, 1>}]} {
    %c0 = arith.constant 0 : index
    %c0_0 = arith.constant 0 : index
    %c0_1 = arith.constant 0 : index
    %0 = vector.load %arg1[%c0, %c0_0, %c0_1] : memref<2x4x256xf32, #tpu.memory_space<vmem>>, vector<2x4x256xf32>
    %1 = tpu.iota {dimensions = array<i32: 1>} : vector<4x256xi32>
    %2 = vector.extract_strided_slice %0 {offsets = [0, 0, 0], sizes = [1, 4, 256], strides = [1, 1, 1]} : vector<2x4x256xf32> to vector<1x4x256xf32>
    %3 = vector.shape_cast %2 : vector<1x4x256xf32> to vector<4x256xf32>
    %cst = arith.constant dense<0.000000e+00> : vector<4xf32>
    %4 = vector.multi_reduction <add>, %3, %cst [1] : vector<4x256xf32> to vector<4xf32>
    %5 = vector.shape_cast %4 : vector<4xf32> to vector<4x1xf32>
    %c0_i32 = arith.constant 0 : i32
    %6 = vector.broadcast %c0_i32 : i32 to vector<4x256xi32>
    %7 = arith.cmpi sge, %1, %6 : vector<4x256xi32>
    %c64_i32 = arith.constant 64 : i32
    %8 = vector.broadcast %c64_i32 : i32 to vector<4x256xi32>
    %9 = arith.cmpi slt, %1, %8 : vector<4x256xi32>
    %10 = arith.andi %7, %9 : vector<4x256xi1>
    %cst_2 = arith.constant 0xFF800000 : f32
    %11 = vector.broadcast %cst_2 : f32 to vector<4x256xf32>
    %12 = arith.select %10, %3, %11 : vector<4x256xi1>, vector<4x256xf32>
    %cst_3 = arith.constant dense<0xFF800000> : vector<4xf32>
    %13 = vector.multi_reduction <maximumf>, %12, %cst_3 [1] : vector<4x256xf32> to vector<4xf32>
    %14 = vector.shape_cast %13 : vector<4xf32> to vector<4x1xf32>
    %cst_4 = arith.constant 0x7F800000 : f32
    %15 = vector.broadcast %cst_4 : f32 to vector<4x256xf32>
    %16 = arith.select %10, %3, %15 : vector<4x256xi1>, vector<4x256xf32>
    %cst_5 = arith.constant dense<0x7F800000> : vector<4xf32>
    %17 = vector.multi_reduction <minimumf>, %16, %cst_5 [1] : vector<4x256xf32> to vector<4xf32>
    %18 = vector.shape_cast %17 : vector<4xf32> to vector<4x1xf32>
    %c64_i32_6 = arith.constant 64 : i32
    %19 = vector.broadcast %c64_i32_6 : i32 to vector<4x256xi32>
    %20 = arith.cmpi sge, %1, %19 : vector<4x256xi32>
    %c128_i32 = arith.constant 128 : i32
    %21 = vector.broadcast %c128_i32 : i32 to vector<4x256xi32>
    %22 = arith.cmpi slt, %1, %21 : vector<4x256xi32>
    %23 = arith.andi %20, %22 : vector<4x256xi1>
    %cst_7 = arith.constant 0xFF800000 : f32
    %24 = vector.broadcast %cst_7 : f32 to vector<4x256xf32>
    %25 = arith.select %23, %3, %24 : vector<4x256xi1>, vector<4x256xf32>
    %cst_8 = arith.constant dense<0xFF800000> : vector<4xf32>
    %26 = vector.multi_reduction <maximumf>, %25, %cst_8 [1] : vector<4x256xf32> to vector<4xf32>
    %27 = vector.shape_cast %26 : vector<4xf32> to vector<4x1xf32>
    %cst_9 = arith.constant 0x7F800000 : f32
    %28 = vector.broadcast %cst_9 : f32 to vector<4x256xf32>
    %29 = arith.select %23, %3, %28 : vector<4x256xi1>, vector<4x256xf32>
    %cst_10 = arith.constant dense<0x7F800000> : vector<4xf32>
    %30 = vector.multi_reduction <minimumf>, %29, %cst_10 [1] : vector<4x256xf32> to vector<4xf32>
    %31 = vector.shape_cast %30 : vector<4xf32> to vector<4x1xf32>
    %c128_i32_11 = arith.constant 128 : i32
    %32 = vector.broadcast %c128_i32_11 : i32 to vector<4x256xi32>
    %33 = arith.cmpi sge, %1, %32 : vector<4x256xi32>
    %c192_i32 = arith.constant 192 : i32
    %34 = vector.broadcast %c192_i32 : i32 to vector<4x256xi32>
    %35 = arith.cmpi slt, %1, %34 : vector<4x256xi32>
    %36 = arith.andi %33, %35 : vector<4x256xi1>
    %cst_12 = arith.constant 0xFF800000 : f32
    %37 = vector.broadcast %cst_12 : f32 to vector<4x256xf32>
    %38 = arith.select %36, %3, %37 : vector<4x256xi1>, vector<4x256xf32>
    %cst_13 = arith.constant dense<0xFF800000> : vector<4xf32>
    %39 = vector.multi_reduction <maximumf>, %38, %cst_13 [1] : vector<4x256xf32> to vector<4xf32>
    %40 = vector.shape_cast %39 : vector<4xf32> to vector<4x1xf32>
    %cst_14 = arith.constant 0x7F800000 : f32
    %41 = vector.broadcast %cst_14 : f32 to vector<4x256xf32>
    %42 = arith.select %36, %3, %41 : vector<4x256xi1>, vector<4x256xf32>
    %cst_15 = arith.constant dense<0x7F800000> : vector<4xf32>
    %43 = vector.multi_reduction <minimumf>, %42, %cst_15 [1] : vector<4x256xf32> to vector<4xf32>
    %44 = vector.shape_cast %43 : vector<4xf32> to vector<4x1xf32>
    %c192_i32_16 = arith.constant 192 : i32
    %45 = vector.broadcast %c192_i32_16 : i32 to vector<4x256xi32>
    %46 = arith.cmpi sge, %1, %45 : vector<4x256xi32>
    %c256_i32 = arith.constant 256 : i32
    %47 = vector.broadcast %c256_i32 : i32 to vector<4x256xi32>
    %48 = arith.cmpi slt, %1, %47 : vector<4x256xi32>
    %49 = arith.andi %46, %48 : vector<4x256xi1>
    %cst_17 = arith.constant 0xFF800000 : f32
    %50 = vector.broadcast %cst_17 : f32 to vector<4x256xf32>
    %51 = arith.select %49, %3, %50 : vector<4x256xi1>, vector<4x256xf32>
    %cst_18 = arith.constant dense<0xFF800000> : vector<4xf32>
    %52 = vector.multi_reduction <maximumf>, %51, %cst_18 [1] : vector<4x256xf32> to vector<4xf32>
    %53 = vector.shape_cast %52 : vector<4xf32> to vector<4x1xf32>
    %cst_19 = arith.constant 0x7F800000 : f32
    %54 = vector.broadcast %cst_19 : f32 to vector<4x256xf32>
    %55 = arith.select %49, %3, %54 : vector<4x256xi1>, vector<4x256xf32>
    %cst_20 = arith.constant dense<0x7F800000> : vector<4xf32>
    %56 = vector.multi_reduction <minimumf>, %55, %cst_20 [1] : vector<4x256xf32> to vector<4xf32>
    %57 = vector.shape_cast %56 : vector<4xf32> to vector<4x1xf32>
    %58 = vector.extract_strided_slice %0 {offsets = [1, 0, 0], sizes = [1, 4, 256], strides = [1, 1, 1]} : vector<2x4x256xf32> to vector<1x4x256xf32>
    %59 = vector.shape_cast %58 : vector<1x4x256xf32> to vector<4x256xf32>
    %cst_21 = arith.constant dense<0.000000e+00> : vector<4xf32>
    %60 = vector.multi_reduction <add>, %59, %cst_21 [1] : vector<4x256xf32> to vector<4xf32>
    %61 = vector.shape_cast %60 : vector<4xf32> to vector<4x1xf32>
    %62 = arith.addf %5, %61 : vector<4x1xf32>
    %c0_i32_22 = arith.constant 0 : i32
    %63 = vector.broadcast %c0_i32_22 : i32 to vector<4x256xi32>
    %64 = arith.cmpi sge, %1, %63 : vector<4x256xi32>
    %c64_i32_23 = arith.constant 64 : i32
    %65 = vector.broadcast %c64_i32_23 : i32 to vector<4x256xi32>
    %66 = arith.cmpi slt, %1, %65 : vector<4x256xi32>
    %67 = arith.andi %64, %66 : vector<4x256xi1>
    %cst_24 = arith.constant 0xFF800000 : f32
    %68 = vector.broadcast %cst_24 : f32 to vector<4x256xf32>
    %69 = arith.select %67, %59, %68 : vector<4x256xi1>, vector<4x256xf32>
    %cst_25 = arith.constant dense<0xFF800000> : vector<4xf32>
    %70 = vector.multi_reduction <maximumf>, %69, %cst_25 [1] : vector<4x256xf32> to vector<4xf32>
    %71 = vector.shape_cast %70 : vector<4xf32> to vector<4x1xf32>
    %cst_26 = arith.constant 0x7F800000 : f32
    %72 = vector.broadcast %cst_26 : f32 to vector<4x256xf32>
    %73 = arith.select %67, %59, %72 : vector<4x256xi1>, vector<4x256xf32>
    %cst_27 = arith.constant dense<0x7F800000> : vector<4xf32>
    %74 = vector.multi_reduction <minimumf>, %73, %cst_27 [1] : vector<4x256xf32> to vector<4xf32>
    %75 = vector.shape_cast %74 : vector<4xf32> to vector<4x1xf32>
    %c64_i32_28 = arith.constant 64 : i32
    %76 = vector.broadcast %c64_i32_28 : i32 to vector<4x256xi32>
    %77 = arith.cmpi sge, %1, %76 : vector<4x256xi32>
    %c128_i32_29 = arith.constant 128 : i32
    %78 = vector.broadcast %c128_i32_29 : i32 to vector<4x256xi32>
    %79 = arith.cmpi slt, %1, %78 : vector<4x256xi32>
    %80 = arith.andi %77, %79 : vector<4x256xi1>
    %cst_30 = arith.constant 0xFF800000 : f32
    %81 = vector.broadcast %cst_30 : f32 to vector<4x256xf32>
    %82 = arith.select %80, %59, %81 : vector<4x256xi1>, vector<4x256xf32>
    %cst_31 = arith.constant dense<0xFF800000> : vector<4xf32>
    %83 = vector.multi_reduction <maximumf>, %82, %cst_31 [1] : vector<4x256xf32> to vector<4xf32>
    %84 = vector.shape_cast %83 : vector<4xf32> to vector<4x1xf32>
    %cst_32 = arith.constant 0x7F800000 : f32
    %85 = vector.broadcast %cst_32 : f32 to vector<4x256xf32>
    %86 = arith.select %80, %59, %85 : vector<4x256xi1>, vector<4x256xf32>
    %cst_33 = arith.constant dense<0x7F800000> : vector<4xf32>
    %87 = vector.multi_reduction <minimumf>, %86, %cst_33 [1] : vector<4x256xf32> to vector<4xf32>
    %88 = vector.shape_cast %87 : vector<4xf32> to vector<4x1xf32>
    %c128_i32_34 = arith.constant 128 : i32
    %89 = vector.broadcast %c128_i32_34 : i32 to vector<4x256xi32>
    %90 = arith.cmpi sge, %1, %89 : vector<4x256xi32>
    %c192_i32_35 = arith.constant 192 : i32
    %91 = vector.broadcast %c192_i32_35 : i32 to vector<4x256xi32>
    %92 = arith.cmpi slt, %1, %91 : vector<4x256xi32>
    %93 = arith.andi %90, %92 : vector<4x256xi1>
    %cst_36 = arith.constant 0xFF800000 : f32
    %94 = vector.broadcast %cst_36 : f32 to vector<4x256xf32>
    %95 = arith.select %93, %59, %94 : vector<4x256xi1>, vector<4x256xf32>
    %cst_37 = arith.constant dense<0xFF800000> : vector<4xf32>
    %96 = vector.multi_reduction <maximumf>, %95, %cst_37 [1] : vector<4x256xf32> to vector<4xf32>
    %97 = vector.shape_cast %96 : vector<4xf32> to vector<4x1xf32>
    %cst_38 = arith.constant 0x7F800000 : f32
    %98 = vector.broadcast %cst_38 : f32 to vector<4x256xf32>
    %99 = arith.select %93, %59, %98 : vector<4x256xi1>, vector<4x256xf32>
    %cst_39 = arith.constant dense<0x7F800000> : vector<4xf32>
    %100 = vector.multi_reduction <minimumf>, %99, %cst_39 [1] : vector<4x256xf32> to vector<4xf32>
    %101 = vector.shape_cast %100 : vector<4xf32> to vector<4x1xf32>
    %c192_i32_40 = arith.constant 192 : i32
    %102 = vector.broadcast %c192_i32_40 : i32 to vector<4x256xi32>
    %103 = arith.cmpi sge, %1, %102 : vector<4x256xi32>
    %c256_i32_41 = arith.constant 256 : i32
    %104 = vector.broadcast %c256_i32_41 : i32 to vector<4x256xi32>
    %105 = arith.cmpi slt, %1, %104 : vector<4x256xi32>
    %106 = arith.andi %103, %105 : vector<4x256xi1>
    %cst_42 = arith.constant 0xFF800000 : f32
    %107 = vector.broadcast %cst_42 : f32 to vector<4x256xf32>
    %108 = arith.select %106, %59, %107 : vector<4x256xi1>, vector<4x256xf32>
    %cst_43 = arith.constant dense<0xFF800000> : vector<4xf32>
    %109 = vector.multi_reduction <maximumf>, %108, %cst_43 [1] : vector<4x256xf32> to vector<4xf32>
    %110 = vector.shape_cast %109 : vector<4xf32> to vector<4x1xf32>
    %cst_44 = arith.constant 0x7F800000 : f32
    %111 = vector.broadcast %cst_44 : f32 to vector<4x256xf32>
    %112 = arith.select %106, %59, %111 : vector<4x256xi1>, vector<4x256xf32>
    %cst_45 = arith.constant dense<0x7F800000> : vector<4xf32>
    %113 = vector.multi_reduction <minimumf>, %112, %cst_45 [1] : vector<4x256xf32> to vector<4xf32>
    %114 = vector.shape_cast %113 : vector<4xf32> to vector<4x1xf32>
    %115 = arith.addf %14, %27 : vector<4x1xf32>
    %116 = arith.addf %18, %31 : vector<4x1xf32>
    %117 = arith.addf %115, %40 : vector<4x1xf32>
    %118 = arith.addf %116, %44 : vector<4x1xf32>
    %119 = arith.addf %117, %53 : vector<4x1xf32>
    %120 = arith.addf %118, %57 : vector<4x1xf32>
    %121 = arith.addf %119, %71 : vector<4x1xf32>
    %122 = arith.addf %120, %75 : vector<4x1xf32>
    %123 = arith.addf %121, %84 : vector<4x1xf32>
    %124 = arith.addf %122, %88 : vector<4x1xf32>
    %125 = arith.addf %123, %97 : vector<4x1xf32>
    %126 = arith.addf %124, %101 : vector<4x1xf32>
    %127 = arith.addf %125, %110 : vector<4x1xf32>
    %128 = arith.addf %126, %114 : vector<4x1xf32>
    %cst_46 = arith.constant 1.250000e-01 : f32
    %129 = vector.broadcast %cst_46 : f32 to vector<4x1xf32>
    %130 = arith.mulf %127, %129 : vector<4x1xf32>
    %cst_47 = arith.constant 1.250000e-01 : f32
    %131 = vector.broadcast %cst_47 : f32 to vector<4x1xf32>
    %132 = arith.mulf %128, %131 : vector<4x1xf32>
    %cst_48 = arith.constant 0.001953125 : f32
    %133 = vector.broadcast %cst_48 : f32 to vector<4x1xf32>
    %134 = arith.mulf %62, %133 : vector<4x1xf32>
    %135 = arith.subf %130, %132 : vector<4x1xf32>
    %cst_49 = arith.constant 0.346734166 : f32
    %136 = vector.broadcast %cst_49 : f32 to vector<4x1xf32>
    %137 = arith.mulf %135, %136 : vector<4x1xf32>
    %cst_50 = arith.constant 9.99999974E-6 : f32
    %138 = vector.broadcast %cst_50 : f32 to vector<4x1xf32>
    %139 = arith.addf %137, %138 : vector<4x1xf32>
    %cst_51 = arith.constant 1.000000e+00 : f32
    %140 = vector.broadcast %cst_51 : f32 to vector<4x1xf32>
    %141 = arith.divf %140, %139 : vector<4x1xf32>
    %c0_52 = arith.constant 0 : index
    %c0_53 = arith.constant 0 : index
    %142 = vector.load %arg5[%c0_52, %c0_53] : memref<4x1xf32, #tpu.memory_space<vmem>>, vector<4x1xf32>
    tpu.vector_store %arg5[%c0_52, %c0_53], %134 {strides = array<i32>} : memref<4x1xf32, #tpu.memory_space<vmem>>, vector<4x1xf32>,
    %c0_54 = arith.constant 0 : index
    %c0_55 = arith.constant 0 : index
    %143 = vector.load %arg6[%c0_54, %c0_55] : memref<4x1xf32, #tpu.memory_space<vmem>>, vector<4x1xf32>
    tpu.vector_store %arg6[%c0_54, %c0_55], %141 {strides = array<i32>} : memref<4x1xf32, #tpu.memory_space<vmem>>, vector<4x1xf32>,
    %c0_56 = arith.constant 0 : index
    %c0_57 = arith.constant 0 : index
    %144 = vector.load %arg2[%c0_56, %c0_57] : memref<4x1xf32, #tpu.memory_space<vmem>>, vector<4x1xf32>
    %c0_58 = arith.constant 0 : index
    %c0_59 = arith.constant 0 : index
    %145 = vector.load %arg3[%c0_58, %c0_59] : memref<4x1xf32, #tpu.memory_space<vmem>>, vector<4x1xf32>
    %146 = arith.mulf %141, %144 : vector<4x1xf32>
    %147 = vector.shape_cast %146 : vector<4x1xf32> to vector<1x4x1xf32>
    %148 = vector.shape_cast %134 : vector<4x1xf32> to vector<1x4x1xf32>
    %149 = vector.shape_cast %145 : vector<4x1xf32> to vector<1x4x1xf32>
    %150 = vector.broadcast %148 : vector<1x4x1xf32> to vector<2x4x256xf32>
    %151 = arith.subf %0, %150 : vector<2x4x256xf32>
    %152 = vector.broadcast %147 : vector<1x4x1xf32> to vector<2x4x256xf32>
    %153 = arith.mulf %151, %152 : vector<2x4x256xf32>
    %154 = vector.broadcast %149 : vector<1x4x1xf32> to vector<2x4x256xf32>
    %155 = arith.addf %153, %154 : vector<2x4x256xf32>
    %c0_60 = arith.constant 0 : index
    %c0_61 = arith.constant 0 : index
    %c0_62 = arith.constant 0 : index
    %156 = vector.load %arg4[%c0_60, %c0_61, %c0_62] : memref<2x4x256xf32, #tpu.memory_space<vmem>>, vector<2x4x256xf32>
    tpu.vector_store %arg4[%c0_60, %c0_61, %c0_62], %155 {strides = array<i32>} : memref<2x4x256xf32, #tpu.memory_space<vmem>>, vector<2x4x256xf32>,
    return
  }
  func.func @transform_0(%arg0: i32) -> (i32, i32, i32) {
    %c0_i32 = arith.constant 0 : i32
    %c0_i32_0 = arith.constant 0 : i32
    %c0_i32_1 = arith.constant 0 : i32
    return %c0_i32, %arg0, %c0_i32_0 : i32, i32, i32
  }
  func.func @transform_1(%arg0: i32) -> (i32, i32) {
    %c0_i32 = arith.constant 0 : i32
    %c0_i32_0 = arith.constant 0 : i32
    %c0_i32_1 = arith.constant 0 : i32
    return %c0_i32, %c0_i32_0 : i32, i32
  }
  func.func @transform_2(%arg0: i32) -> (i32, i32) {
    %c0_i32 = arith.constant 0 : i32
    %c0_i32_0 = arith.constant 0 : i32
    %c0_i32_1 = arith.constant 0 : i32
    return %c0_i32, %c0_i32_0 : i32, i32
  }
  func.func @transform_3(%arg0: i32) -> (i32, i32, i32) {
    %c0_i32 = arith.constant 0 : i32
    %c0_i32_0 = arith.constant 0 : i32
    %c0_i32_1 = arith.constant 0 : i32
    return %c0_i32, %arg0, %c0_i32_0 : i32, i32, i32
  }
  func.func @transform_4(%arg0: i32) -> (i32, i32) {
    %c0_i32 = arith.constant 0 : i32
    %c0_i32_0 = arith.constant 0 : i32
    return %arg0, %c0_i32 : i32, i32
  }
  func.func @transform_5(%arg0: i32) -> (i32, i32) {
    %c0_i32 = arith.constant 0 : i32
    %c0_i32_0 = arith.constant 0 : i32
    return %arg0, %c0_i32 : i32, i32
  }
}

</mosaic_0001>

<bundles_post_ra>
// kernel: tpu_custom_call.1
= control target key start
LH: loop header
LB: loop body
LE: loop exit
PB: predicated region body
PF: predicated region fallthrough
CT: control target
= control target key end

     0   :  { %11 = vsyncpa [#allocation3], 0  ;;  %s459_s0 = inlined_call_operand.hbm [shape: f32[2,4,256], index: 0, kind: input, shape index: {}]   ;;  %s460_s1 = inlined_call_operand.vmem [shape: f32[4,1], index: 1, kind: input, shape index: {}]   ;;  %s461_s2 = inlined_call_operand.vmem [shape: f32[4,1], index: 2, kind: input, shape index: {}]   ;;  %s462_s3 = inlined_call_operand.hbm [shape: f32[2,4,256], index: 3, kind: output, shape index: {0}]   ;;  %s463_s4 = inlined_call_operand.vmem [shape: f32[4,1], index: 4, kind: output, shape index: {1}]   ;;  %s464_s5 = inlined_call_operand.vmem [shape: f32[4,1], index: 5, kind: output, shape index: {2}]  }
   0x1   :  { %12 = vsyncpa [#allocation4], 0  ;;  %s341_s18 = smov [#allocation2]  }
   0x2   :  { %s18_s19 = sshll.u32 %s341_s18, 4  ;;  %s19_s19 = int_to_ptr.vmem [resolvable:$true] %s18_s19 }
   0x3   :  { %s305_s20 = scalar_lea.vmem %s19_s19, 256  ;;  %p310_p1 = scmp.lt.s32.totalorder %s19_s19, %s19_s19 }
   0x4   :  { %p306_p0 = scmp.ne.s32.totalorder %s19_s19, %s305_s20  ;;  %p311_p2 = scmp.lt.s32.totalorder %s305_s20, %s305_s20 }
   0x6   :  { %p312_p3 = por %p311_p2, %p310_p1 }
   0x8   :  { %p313_p4 = pnand %p312_p3, %p306_p0 }
   0xa   :  { %316 = shalt.err (!%p313_p4)
}
   0xb   :  { %s342_s21 = smov 128   ;;  %s343_s22 = smov 8  }
   0xc   :  { %24 = dma.hbm_to_vmem [thread:$0]  %s459_s0, 256, %s19_s19, [#allocation3], %s342_s21, %s342_s21, %s343_s22  }
   0xd   :  { %337 = dma.done.wait [#allocation3], 256  }
   0xe   :  { %338 = vsyncadd [#allocation3], 4294967040  ;;  %v34_v0 = vlaneseq  ;;  %vm40_vm2 = vcmask 1043456   ;;  %v384_v3 = vld [vmem:[#allocation2] sm:$0xff]  ;;  %v406_v19 = vld [vmem:[#allocation2 + $0x8] sm:$0xff]  ;;  %v344_v45 = vmov 0  }
   0xf   :  { %v38_v10 = vcombine.high %v384_v3, %v384_v3  ;;  %v127_v28 = vcombine.high %v406_v19, %v406_v19  ;;  %v129_v39 = vsel %vm40_vm2, %v406_v19, 0.0  ;;  %v41_v41 = vsel %vm40_vm2, %v384_v3, 0.0  ;;  %291 = vset.pattern.permute.xlu0 %v344_v45  ;;  %292 = vset.pattern.permute.xlu1 %v344_v45  ;;  %v217_v46 = vld [vmem:[%s461_s2] sm:$0xf] }
  0x10   :  { %v35_v1 = vand.u32 127, %v34_v0  ;;  %vm213_vm5 = vcmask 3072  }
  0x11   :  { %v130_v40 = vsel %vm40_vm2, %v127_v28, 0.0  ;;  %v42_v42 = vsel %vm40_vm2, %v38_v10, 0.0 }
  0x12   :  { %vm66_vm0 = vcmp.ge.s32.totalorder %v35_v1, 64  ;;  %vm48_vm1 = vcmp.lt.s32.totalorder %v35_v1, 64  ;;  %v36_v2 = vadd.s32 128, %v35_v1  ;;  %v131_v43 = vadd.f32 %v130_v40, %v129_v39 }
  0x13   :  { %v72_v4 = vsel %vm66_vm0, %v384_v3, -inf  ;;  %v52_v5 = vsel %vm48_vm1, %v384_v3, -inf  ;;  %v79_v6 = vsel %vm66_vm0, %v384_v3, inf  ;;  %v59_v7 = vsel %vm48_vm1, %v384_v3, inf }
  0x14   :  { %v74_v8 = vsel %vm40_vm2, %v72_v4, -inf  ;;  %v54_v9 = vsel %vm40_vm2, %v52_v5, -inf  ;;  %vm89_vm3 = vcmp.lt.s32.totalorder %v36_v2, 192  ;;  %v81_v11 = vsel %vm40_vm2, %v79_v6, inf }
  0x15   :  { %77 = vmax.xlane.f32.xlu1 %v74_v8  ;;  %57 = vmax.xlane.f32.xlu0 %v54_v9  ;;  %v61_v12 = vsel %vm40_vm2, %v59_v7, inf  ;;  %v100_v13 = vsel %vm89_vm3, %v38_v10, inf  ;;  %v93_v14 = vsel %vm89_vm3, %v38_v10, -inf  ;;  %vm107_vm4 = vcmp.ge.s32.totalorder %v36_v2, 192 }
  0x16   :  { %v102_v15 = vsel %vm40_vm2, %v100_v13, inf  ;;  %v95_v16 = vsel %vm40_vm2, %v93_v14, -inf  ;;  %v120_v17 = vsel %vm107_vm4, %v38_v10, inf  ;;  %v113_v18 = vsel %vm107_vm4, %v38_v10, -inf }
  0x17   :  { %v122_v20 = vsel %vm40_vm2, %v120_v17, inf  ;;  %v115_v21 = vsel %vm40_vm2, %v113_v18, -inf  ;;  %v142_v22 = vsel %vm48_vm1, %v406_v19, inf  ;;  %v135_v23 = vsel %vm48_vm1, %v406_v19, -inf }
  0x18   :  { %v144_v24 = vsel %vm40_vm2, %v142_v22, inf  ;;  %v137_v25 = vsel %vm40_vm2, %v135_v23, -inf  ;;  %v156_v26 = vsel %vm66_vm0, %v406_v19, inf  ;;  %v149_v27 = vsel %vm66_vm0, %v406_v19, -inf }
  0x19   :  { %84 = vmin.xlane.f32.xlu1 %v81_v11  ;;  %64 = vmin.xlane.f32.xlu0 %v61_v12  ;;  %v158_v29 = vsel %vm40_vm2, %v156_v26, inf  ;;  %v151_v30 = vsel %vm40_vm2, %v149_v27, -inf  ;;  %v171_v31 = vsel %vm89_vm3, %v127_v28, inf  ;;  %v164_v32 = vsel %vm89_vm3, %v127_v28, -inf }
  0x1a   :  { %v173_v33 = vsel %vm40_vm2, %v171_v31, inf  ;;  %v166_v34 = vsel %vm40_vm2, %v164_v32, -inf  ;;  %v185_v35 = vsel %vm107_vm4, %v127_v28, inf  ;;  %v178_v36 = vsel %vm107_vm4, %v127_v28, -inf }
  0x1b   :  { %v187_v37 = vsel %vm40_vm2, %v185_v35, inf  ;;  %v180_v38 = vsel %vm40_vm2, %v178_v36, -inf  ;;  %v43_v44 = vadd.f32 %v42_v42, %v41_v41  ;;  %v345_v28 = vmov 839922192  }
  0x1c   :  { %v224_v31 = vshrl.u32 %v34_v0, 7 }
  0x1d   :  { %104 = vmin.xlane.f32.xlu1 %v102_v15  ;;  %97 = vmax.xlane.f32.xlu0 %v95_v16 }
  0x21   :  { %124 = vmin.xlane.f32.xlu1 %v122_v20  ;;  %117 = vmax.xlane.f32.xlu0 %v115_v21 }
  0x25   :  { %147 = vmin.xlane.f32.xlu1 %v144_v24  ;;  %140 = vmax.xlane.f32.xlu0 %v137_v25  ;;  %v216_v25 = vld [vmem:[%s460_s1] sm:$0xf]  ;;  %s346_s1 = smov [#allocation5]  }
  0x29   :  { %161 = vmin.xlane.f32.xlu1 %v158_v29  ;;  %154 = vmax.xlane.f32.xlu0 %v151_v30  ;;  %v221_v29 = vunpack.c.l.s4 %v345_v28 }
  0x2b   :  { %v222_v30 = vunpack.c.0.s8 %v221_v29 }
  0x2d   :  { %175 = vmin.xlane.f32.xlu1 %v173_v33  ;;  %168 = vmax.xlane.f32.xlu0 %v166_v34  ;;  %v225_v32 = vsub.s32 %v222_v30, %v224_v31 }
  0x31   :  { %189 = vmin.xlane.f32.xlu1 %v187_v37  ;;  %182 = vmax.xlane.f32.xlu0 %v180_v38 }
  0x35   :  { %132 = vadd.xlane.f32.xlu1 %v131_v43  ;;  %44 = vadd.xlane.f32.xlu0 %v43_v44 }
  0x46   :  { %246 = vperm.xlu1 %292, %v217_v46  }
  0x9e   :  { %v78_v47 = vpop.xlane.xlu1 %77  ;;  %v58_v48 = vpop.xlane.xlu0 %57 }
  0x9f   :  { %v191_v57 = vadd.f32 %v78_v47, %v58_v48 }
  0xa2   :  { %v85_v49 = vpop.xlane.xlu1 %84  ;;  %v65_v50 = vpop.xlane.xlu0 %64 }
  0xa3   :  { %v192_v58 = vadd.f32 %v85_v49, %v65_v50 }
  0xa6   :  { %v105_v51 = vpop.xlane.xlu1 %104  ;;  %v98_v52 = vpop.xlane.xlu0 %97 }
  0xa7   :  { %v194_v59 = vadd.f32 %v192_v58, %v105_v51  ;;  %v193_v60 = vadd.f32 %v191_v57, %v98_v52 }
  0xaa   :  { %v125_v53 = vpop.xlane.xlu1 %124  ;;  %v118_v54 = vpop.xlane.xlu0 %117 }
  0xab   :  { %v196_v63 = vadd.f32 %v194_v59, %v125_v53  ;;  %v195_v1 = vadd.f32 %v193_v60, %v118_v54 }
  0xae   :  { %v148_v55 = vpop.xlane.xlu1 %147  ;;  %v141_v56 = vpop.xlane.xlu0 %140 }
  0xaf   :  { %v198_v2 = vadd.f32 %v196_v63, %v148_v55  ;;  %v197_v4 = vadd.f32 %v195_v1, %v141_v56 }
  0xb2   :  { %v162_v61 = vpop.xlane.xlu1 %161  ;;  %v155_v62 = vpop.xlane.xlu0 %154 }
  0xb3   :  { %v200_v7 = vadd.f32 %v198_v2, %v162_v61  ;;  %v199_v8 = vadd.f32 %v197_v4, %v155_v62 }
  0xb6   :  { %v176_v5 = vpop.xlane.xlu1 %175  ;;  %v169_v6 = vpop.xlane.xlu0 %168 }
  0xb7   :  { %v202_v9 = vadd.f32 %v200_v7, %v176_v5  ;;  %v201_v10 = vadd.f32 %v199_v8, %v169_v6 }
  0xba   :  { %v190_v11 = vpop.xlane.xlu1 %189  ;;  %v183_v12 = vpop.xlane.xlu0 %182 }
  0xbb   :  { %v204_v13 = vadd.f32 %v202_v9, %v190_v11  ;;  %v203_v14 = vadd.f32 %v201_v10, %v183_v12 }
  0xbd   :  { %v206_v15 = vmul.f32 0.125, %v204_v13  ;;  %v205_v16 = vmul.f32 0.125, %v203_v14 }
  0xbe   :  { %v133_v21 = vpop.xlane.xlu1 %132  ;;  %v45_v22 = vpop.xlane.xlu0 %44 }
  0xbf   :  { %v208_v17 = vsub.f32 %v205_v16, %v206_v15  ;;  %v134_v23 = vadd.f32 %v133_v21, %v45_v22 }
  0xc1   :  { %v209_v18 = vmul.f32 0.34673417, %v208_v17  ;;  %v207_v24 = vmul.f32 0.001953125, %v134_v23 }
  0xc2   :  { %v247_v34 = vpop.permute.xlu1 %246 }
  0xc3   :  { %v210_v20 = vadd.f32 1e-05, %v209_v18  ;;  %214 = vst.msk [vmem:[%s463_s4] sm:$0xf] %vm213_vm5, %v207_v24  ;;  %v226_v33 = vrot.slane %v207_v24, %v225_v32  ;;  %v254_v39 = vrot.slane %v247_v34, %v225_v32  ;;  %s265_s4 = sshll.u32 %s346_s1, 4  ;;  %s266_s4 = int_to_ptr.vmem [resolvable:$true] %s265_s4 }
  0xc4   :  { %p322_p6 = scmp.lt.s32.totalorder %s266_s4, %s266_s4 }
  0xc5   :  { %295 = vrcp.f32 %v210_v20  ;;  %v228_v36 = vsub.f32 %v384_v3, %v226_v33  ;;  %v229_v37 = vsub.f32 %v406_v19, %v226_v33 }
  0xd2   :  { %v296_v26 = vpop.eup %295 }
  0xd3   :  { %v218_v27 = vmul.f32 %v296_v26, %v216_v25  ;;  %215 = vst.msk [vmem:[%s464_s5] sm:$0xf] %vm213_vm5, %v296_v26  ;;  %s317_s5 = scalar_lea.vmem %s266_s4, 256 }
  0xd4   :  { %p318_p5 = scmp.ne.s32.totalorder %s266_s4, %s317_s5  ;;  %p323_p7 = scmp.lt.s32.totalorder %s317_s5, %s317_s5 }
  0xd5   :  { %232 = vperm.xlu0 %291, %v218_v27  }
  0xd6   :  { %p324_p8 = por %p323_p7, %p322_p6 }
  0xd8   :  { %p325_p9 = pnand %p324_p8, %p318_p5 }
 0x150   :  { %v233_v35 = vpop.permute.xlu0 %232 }
 0x151   :  { %v240_v38 = vrot.slane %v233_v35, %v225_v32 }
 0x153   :  { %v242_v40 = vmul.f32 %v240_v38, %v228_v36  ;;  %v243_v41 = vmul.f32 %v240_v38, %v229_v37 }
 0x155   :  { %v256_v42 = vadd.f32 %v254_v39, %v242_v40  ;;  %v257_v43 = vadd.f32 %v254_v39, %v243_v41 }
 0x157   :  { %258 = vst [vmem:[#allocation5] sm:$0xff] %v256_v42  ;;  %259 = vst [vmem:[#allocation5 + $0x8] sm:$0xff] %v257_v43 }
 0x158   :  { %328 = shalt.err (!%p325_p9)
}
 0x159   :  { %271 = dma.vmem_to_hbm [thread:$0]  %s266_s4, 256, %s462_s3, [#allocation4], %s342_s21, %s342_s21, %s343_s22  }
 0x15a   :  { %339 = dma.done.wait [#allocation4], 256  }
 0x15b   :  { %340 = vsyncadd [#allocation4], 4294967040 }
 0x15c   :  { %283 = vsyncpa [#allocation3], 1 }
 0x15d   :  { %284 = vsyncpa [#allocation4], 1 }

</bundles_post_ra>
